<compile_context>
chip_gen: v5e
topology: v5e:2x2
jax: 0.10.0
libtpu: 0.0.40
codegen_flags: <defaults>
</compile_context>

<pallas_src>
import jax
import jax.numpy as jnp
import numpy as np
from jax.experimental import pallas as pl
from jax.experimental.pallas import tpu as pltpu

_LANE = 128
_SUBLANE = 8


def _cnn_tail_kernel(feat_ref, w_ref, shift_ref, out_ref):
    """Fused global-avg-pool -> Linear -> BatchNorm1d(eval); BN/bias/1/S pre-folded.

    grid = (batch tiles [parallel], E tiles [parallel], channel tiles [reduction])
    feat_ref : (tn, tc, S)   channel chunk of the trunk's (N, C, H*W) feature map
    w_ref    : (tc, te)      folded weight chunk  (W * gamma*rsqrt(var+eps) / S)
    shift_ref: (1, te)  f32  folded shift         ((b - mean)*scale + beta)
    out_ref  : (tn, te) f32  resident across the channel axis -> used as accumulator
    """
    k = pl.program_id(2)

    @pl.when(k == 0)
    def _():
        out_ref[...] = jnp.broadcast_to(shift_ref[...], out_ref.shape)

    # Lane reduction with f32 accumulation; no explicit f32 copy of the block.
    pooled = jnp.sum(feat_ref[...], axis=-1, dtype=jnp.float32)          # (tn, tc)
    # bf16 weight is promoted in-vreg; accumulation stays f32 on the MXU.
    out_ref[...] += jnp.dot(pooled, w_ref[...],
                            preferred_element_type=jnp.float32)


def _round_up(x, m):
    return (x + m - 1) // m * m


def _sublane_multiple(itemsize):
    # f32 -> 8 sublanes per tile, bf16 -> 16, int8/fp8 -> 32.
    return _SUBLANE * max(1, 4 // itemsize)


def _vmem_limit_bytes():
    """Generation-aware VMEM limit: ~3/4 of physical capacity, capped at 96 MiB."""
    cap = None
    try:
        info = pltpu.get_tpu_info()
        for name in ("vmem_capacity_bytes", "vmem_bytes", "vmem_capacity"):
            cap = getattr(info, name, None)
            if cap:
                break
    except Exception:
        cap = None
    if not cap:
        cap = 64 * 1024 * 1024                       # conservative: v7x physical
    return int(max(32 * 1024 * 1024, min(96 * 1024 * 1024, (cap * 3) // 4)))


def _block_vmem_bytes(tn, tc, s, te, feat_itemsize, w_itemsize):
    """Per-grid-step VMEM footprint, including lane/sublane padding and the
    double-buffering of pipelined operands."""
    s_pad = _round_up(s, _LANE)                      # 49 -> 128 lanes in VMEM
    feat = 2 * tn * _round_up(tc, _sublane_multiple(feat_itemsize)) * s_pad \
        * feat_itemsize
    wgt = 2 * _round_up(tc, _sublane_multiple(w_itemsize)) * te * w_itemsize
    out = 2 * _round_up(tn, _SUBLANE) * te * 4
    shift = 2 * _SUBLANE * te * 4
    return feat + wgt + out + shift


def _pick_tiles(n, c, s, e_pad, feat_itemsize, w_itemsize, budget_bytes):
    """Pick (tn, tc): prefer a full-C single-step reduction (weight streamed once,
    no re-accumulation) and shrink the batch tile first; only fragment the channel
    axis if even the smallest legal tn does not fit the padded VMEM budget."""
    def fits(tn, tc):
        return _block_vmem_bytes(tn, tc, s, e_pad, feat_itemsize,
                                 w_itemsize) <= budget_bytes

    # Legal batch tiles: tn == n, or a multiple of 8 that divides n.
    split_opts = sorted([t for t in range(8, n, 8) if n % t == 0], reverse=True)
    # For non-trivial batches prefer >=2 batch tiles (megacore work split),
    # otherwise prefer the single full-batch tile.
    tn_order = (split_opts + [n]) if (n >= 16 and split_opts) else ([n] + split_opts)
    for tn in tn_order:
        if fits(tn, c):
            return tn, c
    # Fallback: smallest legal batch tile, fragment the channel reduction.
    tn = split_opts[-1] if split_opts else n
    best = _SUBLANE
    for tc in range(_SUBLANE, c, _SUBLANE):
        if c % tc == 0 and fits(tn, tc):
            best = tc
    return tn, best


def cnn_model_forward(feature_map_nchw, params, *, eps=1e-5,
                      weight_dtype=jnp.bfloat16, max_tc=None):
    """Tail of CNNModel.forward.

    feature_map_nchw: (N, C, H, W) trunk output (pre-avgpool), f32 or bf16.
    params: "w" (C, E) [= torch linear.weight.T], "b", "gamma", "beta",
            "running_mean", "running_var" (all (E,)).
    Returns (N, E) float32: avgpool -> flatten -> Linear -> BatchNorm1d(eval).
    """
    n, c, h, w = feature_map_nchw.shape
    s = h * w
    assert c % _SUBLANE == 0, "channel count must be a multiple of 8"

    # Free contiguous reshape; no HBM-rewriting transpose.
    # TODO(synk): if the trunk can emit NHWC, consume (N, S, C) instead (C on lanes)
    # to avoid the 49->128 lane padding; never add a wrapper transpose just for it.
    feat = feature_map_nchw.reshape(n, c, s)

    # Fold 1/S + Linear bias + eval-mode BatchNorm into (weight, shift), in f32.
    w_lin = params["w"].astype(jnp.float32)                          # (C, E)
    e = w_lin.shape[1]
    scale = params["gamma"].astype(jnp.float32) * jax.lax.rsqrt(
        params["running_var"].astype(jnp.float32) + eps)             # (E,)
    w_fold = w_lin * (scale / float(s))[None, :]                     # (C, E)
    shift = ((params["b"].astype(jnp.float32)
              - params["running_mean"].astype(jnp.float32)) * scale
             + params["beta"].astype(jnp.float32))                   # (E,)

    # Lane-dense output: pad E up to a multiple of 128, slice after the kernel.
    e_pad = max(_LANE, _round_up(e, _LANE))
    if e_pad != e:
        w_fold = jnp.pad(w_fold, ((0, 0), (0, e_pad - e)))
        shift = jnp.pad(shift, (0, e_pad - e))
    w_fold = w_fold.astype(weight_dtype)     # bf16 by default: halves HBM + VMEM
    shift = shift.reshape(1, e_pad)          # stays f32 (tiny)

    feat_itemsize = jnp.dtype(feat.dtype).itemsize
    w_itemsize = jnp.dtype(w_fold.dtype).itemsize
    vmem_limit = _vmem_limit_bytes()
    budget = vmem_limit - 2 * 1024 * 1024    # headroom for compiler-internal scratch

    tn, tc = _pick_tiles(n, c, s, e_pad, feat_itemsize, w_itemsize, budget)
    if max_tc is not None and tc > max_tc:   # test / tuning knob
        tc = max(t for t in range(_SUBLANE, max_tc + 1, _SUBLANE) if c % t == 0)
    nb, kc = n // tn, c // tc

    # Small-batch megacore path: single batch tile + single-step reduction -> split
    # E across a second "parallel" axis so both TensorCores (v7x) have work.
    te = _LANE if (nb == 1 and tc == c and e_pad >= 2 * _LANE) else e_pad
    ne = e_pad // te

    grid = (nb, ne, kc)

    cost = pl.CostEstimate(
        flops=2 * n * c * e_pad + n * c * s,
        transcendentals=0,
        bytes_accessed=n * c * s * feat_itemsize + c * e_pad * w_itemsize
        + n * e_pad * 4,
    )

    out = pl.pallas_call(
        _cnn_tail_kernel,
        out_shape=jax.ShapeDtypeStruct((n, e_pad), jnp.float32),
        grid_spec=pltpu.PrefetchScalarGridSpec(
            num_scalar_prefetch=0,
            grid=grid,
            in_specs=[
                pl.BlockSpec((tn, tc, s), lambda i, j, k: (i, k, 0)),   # features
                pl.BlockSpec((tc, te), lambda i, j, k: (k, j)),         # folded W
                pl.BlockSpec((1, te), lambda i, j, k: (0, j)),          # folded shift
            ],
            out_specs=pl.BlockSpec((tn, te), lambda i, j, k: (i, j)),
        ),
        compiler_params=pltpu.CompilerParams(
            dimension_semantics=("parallel", "parallel", "arbitrary"),
            vmem_limit_bytes=vmem_limit,
        ),
        cost_estimate=cost,
    )(feat, w_fold, shift)

    return out[:, :e] if e_pad != e else out


def _reference(feature_map_nchw, params, eps=1e-5):
    """Pure-JAX reference of the same tail (un-folded math), for correctness."""
    pooled = jnp.mean(feature_map_nchw.astype(jnp.float32), axis=(2, 3))   # (N, C)
    lin = pooled @ params["w"] + params["b"]                               # (N, E)
    inv_std = jax.lax.rsqrt(params["running_var"] + eps)
    return (lin - params["running_mean"]) * inv_std * params["gamma"] + params["beta"]


if __name__ == "__main__":
    # Small shapes standing in for the real ones (real: C=2048, H=W=7, E=256).
    key = jax.random.PRNGKey(0)

    def make(n, c, h, w, e, feat_dtype):
        ks = jax.random.split(key, 7)
        feature_map = jax.random.normal(ks[0], (n, c, h, w),
                                        jnp.float32).astype(feat_dtype)
        params = {
            "w": jax.random.normal(ks[1], (c, e), jnp.float32) * 0.02,
            "b": jax.random.normal(ks[2], (e,), jnp.float32) * 0.01,
            "gamma": 1.0 + 0.1 * jax.random.normal(ks[3], (e,), jnp.float32),
            "beta": 0.1 * jax.random.normal(ks[4], (e,), jnp.float32),
            "running_mean": 0.1 * jax.random.normal(ks[5], (e,), jnp.float32),
            "running_var": jax.random.uniform(ks[6], (e,), jnp.float32,
                                              minval=0.5, maxval=1.5),
        }
        return feature_map, params

    # 1) f32 features + exact f32 weights; single-step channel grid; E padded 32->128.
    fm, p = make(4, 256, 7, 7, 32, jnp.float32)
    out = jax.block_until_ready(cnn_model_forward(fm, p, weight_dtype=jnp.float32))
    ref = jax.block_until_ready(_reference(fm, p))
    np.testing.assert_allclose(np.asarray(out), np.asarray(ref),
                               rtol=1e-3, atol=1e-4)

    # 2) bf16 features + default bf16 folded weight (HBM-saving path); f32 accumulate.
    fm16, p2 = make(4, 256, 7, 7, 32, jnp.bfloat16)
    out2 = jax.block_until_ready(cnn_model_forward(fm16, p2))
    ref2 = jax.block_until_ready(_reference(fm16.astype(jnp.float32), p2))
    np.testing.assert_allclose(np.asarray(out2), np.asarray(ref2),
                               rtol=2e-2, atol=2e-3)

    # 3) multi batch-tile ("parallel" axis) + forced multi-step channel reduction.
    fm3, p3 = make(16, 256, 7, 7, 32, jnp.float32)
    out3 = jax.block_until_ready(
        cnn_model_forward(fm3, p3, weight_dtype=jnp.float32, max_tc=64))
    ref3 = jax.block_until_ready(_reference(fm3, p3))
    np.testing.assert_allclose(np.asarray(out3), np.asarray(ref3),
                               rtol=1e-3, atol=1e-4)

    # 4) small batch with E_pad=256 -> E split across the second "parallel" axis.
    fm4, p4 = make(4, 256, 7, 7, 160, jnp.float32)
    out4 = jax.block_until_ready(
        cnn_model_forward(fm4, p4, weight_dtype=jnp.float32))
    ref4 = jax.block_until_ready(_reference(fm4, p4))
    np.testing.assert_allclose(np.asarray(out4), np.asarray(ref4),
                               rtol=1e-3, atol=1e-4)

    print("KERNEL_OK")
</pallas_src>

<mosaic_0001>
module attributes {stable_mosaic.version = 11 : i64} {
  func.func @_cnn_tail_kernel(%arg0: i32, %arg1: i32, %arg2: i32, %arg3: memref<4x256x49xf32, #tpu.memory_space<vmem>>, %arg4: memref<256x128xf32, #tpu.memory_space<vmem>>, %arg5: memref<1x128xf32, #tpu.memory_space<vmem>>, %arg6: memref<4x128xf32, #tpu.memory_space<vmem>>) attributes {dimension_semantics = [#tpu.dimension_semantics<parallel>, #tpu.dimension_semantics<parallel>, #tpu.dimension_semantics<arbitrary>], iteration_bounds = array<i64: 1, 1, 1>, scalar_prefetch = 0 : i64, scratch_operands = 0 : i64, tpu.core_type = #tpu.core_type<tc>, window_params = [{transform_indices = @transform_0, window_bounds = array<i64: 4, 256, 49>}, {transform_indices = @transform_1, window_bounds = array<i64: 256, 128>}, {transform_indices = @transform_2, window_bounds = array<i64: 1, 128>}, {transform_indices = @transform_3, window_bounds = array<i64: 4, 128>}]} {
    %c0_i32 = arith.constant 0 : i32
    %0 = arith.cmpi eq, %arg2, %c0_i32 : i32
    %1 = arith.extui %0 : i1 to i32
    %c0_i32_0 = arith.constant 0 : i32
    %2 = arith.cmpi ne, %1, %c0_i32_0 : i32
    scf.if %2 {
      %c0_10 = arith.constant 0 : index
      %c0_11 = arith.constant 0 : index
      %10 = vector.load %arg5[%c0_10, %c0_11] : memref<1x128xf32, #tpu.memory_space<vmem>>, vector<1x128xf32>
      %11 = vector.shape_cast %10 : vector<1x128xf32> to vector<1x128xf32>
      %12 = vector.broadcast %11 : vector<1x128xf32> to vector<4x128xf32>
      %c0_12 = arith.constant 0 : index
      %c0_13 = arith.constant 0 : index
      %13 = vector.load %arg6[%c0_12, %c0_13] : memref<4x128xf32, #tpu.memory_space<vmem>>, vector<4x128xf32>
      tpu.vector_store %arg6[%c0_12, %c0_13], %12 {strides = array<i32>} : memref<4x128xf32, #tpu.memory_space<vmem>>, vector<4x128xf32>,
    } else {
    }
    %c0 = arith.constant 0 : index
    %c0_1 = arith.constant 0 : index
    %c0_2 = arith.constant 0 : index
    %3 = vector.load %arg3[%c0, %c0_1, %c0_2] : memref<4x256x49xf32, #tpu.memory_space<vmem>>, vector<4x256x49xf32>
    %cst = arith.constant dense<0.000000e+00> : vector<4x256xf32>
    %4 = vector.multi_reduction <add>, %3, %cst [2] : vector<4x256x49xf32> to vector<4x256xf32>
    %c0_3 = arith.constant 0 : index
    %c0_4 = arith.constant 0 : index
    %5 = vector.load %arg6[%c0_3, %c0_4] : memref<4x128xf32, #tpu.memory_space<vmem>>, vector<4x128xf32>
    %c0_5 = arith.constant 0 : index
    %c0_6 = arith.constant 0 : index
    %6 = vector.load %arg4[%c0_5, %c0_6] : memref<256x128xf32, #tpu.memory_space<vmem>>, vector<256x128xf32>
    %cst_7 = arith.constant dense<0.000000e+00> : vector<4x128xf32>
    %7 = tpu.matmul %4, %6, %cst_7 {dimension_numbers = #tpu.dot_dimension_numbers<[1], [0], [0], [1], [0, 0, 1, 1], [], []>} : vector<4x256xf32>, vector<256x128xf32>, vector<4x128xf32> -> vector<4x128xf32>
    %8 = arith.addf %5, %7 : vector<4x128xf32>
    %c0_8 = arith.constant 0 : index
    %c0_9 = arith.constant 0 : index
    %9 = vector.load %arg6[%c0_8, %c0_9] : memref<4x128xf32, #tpu.memory_space<vmem>>, vector<4x128xf32>
    tpu.vector_store %arg6[%c0_8, %c0_9], %8 {strides = array<i32>} : memref<4x128xf32, #tpu.memory_space<vmem>>, vector<4x128xf32>,
    return
  }
  func.func @transform_0(%arg0: i32, %arg1: i32, %arg2: i32) -> (i32, i32, i32) {
    %c0_i32 = arith.constant 0 : i32
    %c0_i32_0 = arith.constant 0 : i32
    return %arg0, %arg2, %c0_i32 : i32, i32, i32
  }
  func.func @transform_1(%arg0: i32, %arg1: i32, %arg2: i32) -> (i32, i32) {
    %c0_i32 = arith.constant 0 : i32
    return %arg2, %arg1 : i32, i32
  }
  func.func @transform_2(%arg0: i32, %arg1: i32, %arg2: i32) -> (i32, i32) {
    %c0_i32 = arith.constant 0 : i32
    %c0_i32_0 = arith.constant 0 : i32
    return %c0_i32, %arg1 : i32, i32
  }
  func.func @transform_3(%arg0: i32, %arg1: i32, %arg2: i32) -> (i32, i32) {
    %c0_i32 = arith.constant 0 : i32
    return %arg0, %arg1 : i32, i32
  }
}

</mosaic_0001>

<bundles_post_ra>
// kernel: tpu_custom_call.1
= control target key start
LH: loop header
LB: loop body
LE: loop exit
PB: predicated region body
PF: predicated region fallthrough
CT: control target
= control target key end

     0   :  { %vm152_vm0 = vcmask 400384   ;;  %s2072_s0 = inlined_call_operand.vmem [shape: f32[4,256,49], index: 0, kind: input, shape index: {}]   ;;  %s2073_s1 = inlined_call_operand.vmem [shape: f32[256,128], index: 1, kind: input, shape index: {}]   ;;  %s2074_s2 = inlined_call_operand.vmem [shape: f32[1,128], index: 2, kind: input, shape index: {}]   ;;  %s2075_s3 = inlined_call_operand.hbm [shape: f32[4,128], index: 3, kind: output, shape index: {}]  }
   0x1   :  { %v28_v0 = vld [vmem:[%s2072_s0 + $0x20] sm:$0xff]  ;;  %v26_v1 = vld [vmem:[%s2072_s0 + $0x10] sm:$0xff]  ;;  %v29_v6 = vld [vmem:[%s2072_s0 + $0x28] sm:$0xff] }
   0x2   :  { %v24_v2 = vld [vmem:[%s2072_s0] sm:$0xff]  ;;  %v165_v3 = vsel %vm152_vm0, %v28_v0, 0.0  ;;  %v159_v4 = vsel %vm152_vm0, %v26_v1, 0.0  ;;  %v27_v7 = vld [vmem:[%s2072_s0 + $0x18] sm:$0xff]  ;;  %v25_v8 = vld [vmem:[%s2072_s0 + $0x8] sm:$0xff] }
   0x3   :  { %v153_v5 = vsel %vm152_vm0, %v24_v2, 0.0  ;;  %166 = vadd.xlane.f32.xlu2 %v165_v3  ;;  %160 = vadd.xlane.f32.xlu1 %v159_v4 }
   0x4   :  { %154 = vadd.xlane.f32.xlu0 %v153_v5 }
   0x5   :  { %8 = vsyncpa [#allocation3], 0  ;;  %v168_v9 = vsel %vm152_vm0, %v29_v6, 0.0  ;;  %v162_v10 = vsel %vm152_vm0, %v27_v7, 0.0  ;;  %v156_v11 = vsel %vm152_vm0, %v25_v8, 0.0  ;;  %v32_v12 = vld [vmem:[%s2072_s0 + $0x40] sm:$0xff] }
   0x6   :  { %v31_v13 = vld [vmem:[%s2072_s0 + $0x38] sm:$0xff]  ;;  %v30_v14 = vld [vmem:[%s2072_s0 + $0x30] sm:$0xff]  ;;  %v177_v15 = vsel %vm152_vm0, %v32_v12, 0.0  ;;  %v33_v20 = vld [vmem:[%s2072_s0 + $0x48] sm:$0xff]  ;;  %vm703_vm1 = vcmask 130112   ;;  %vm707_vm2 = vcmask 195712  }
   0x7   :  { %v174_v16 = vsel %vm152_vm0, %v31_v13, 0.0  ;;  %v171_v17 = vsel %vm152_vm0, %v30_v14, 0.0  ;;  %v35_v18 = vld [vmem:[%s2072_s0 + $0x58] sm:$0xff]  ;;  %v34_v19 = vld [vmem:[%s2072_s0 + $0x50] sm:$0xff]  ;;  %v180_v23 = vsel %vm152_vm0, %v33_v20, 0.0  ;;  %v37_v25 = vld [vmem:[%s2072_s0 + $0x68] sm:$0xff] }
   0x8   :  { %v186_v21 = vsel %vm152_vm0, %v35_v18, 0.0  ;;  %v183_v22 = vsel %vm152_vm0, %v34_v19, 0.0  ;;  %v38_v24 = vld [vmem:[%s2072_s0 + $0x70] sm:$0xff]  ;;  %v36_v26 = vld [vmem:[%s2072_s0 + $0x60] sm:$0xff]  ;;  %v192_v28 = vsel %vm152_vm0, %v37_v25, 0.0  ;;  %v41_v30 = vld [vmem:[%s2072_s0 + $0x88] sm:$0xff] }
   0x9   :  { %v195_v27 = vsel %vm152_vm0, %v38_v24, 0.0  ;;  %v189_v29 = vsel %vm152_vm0, %v36_v26, 0.0  ;;  %v40_v31 = vld [vmem:[%s2072_s0 + $0x80] sm:$0xff]  ;;  %v39_v32 = vld [vmem:[%s2072_s0 + $0x78] sm:$0xff]  ;;  %v204_v33 = vsel %vm152_vm0, %v41_v30, 0.0  ;;  %v42_v38 = vld [vmem:[%s2072_s0 + $0x90] sm:$0xff]  ;;  %v698_v26 = vlaneseq }
   0xa   :  { %v201_v34 = vsel %vm152_vm0, %v40_v31, 0.0  ;;  %v198_v35 = vsel %vm152_vm0, %v39_v32, 0.0  ;;  %v44_v36 = vld [vmem:[%s2072_s0 + $0xa0] sm:$0xff]  ;;  %v43_v37 = vld [vmem:[%s2072_s0 + $0x98] sm:$0xff]  ;;  %v207_v41 = vsel %vm152_vm0, %v42_v38, 0.0  ;;  %v46_v43 = vld [vmem:[%s2072_s0 + $0xb0] sm:$0xff] }
   0xb   :  { %169 = vadd.xlane.f32.xlu2 %v168_v9  ;;  %163 = vadd.xlane.f32.xlu1 %v162_v10  ;;  %v213_v39 = vsel %vm152_vm0, %v44_v36, 0.0  ;;  %v210_v40 = vsel %vm152_vm0, %v43_v37, 0.0  ;;  %v47_v42 = vld [vmem:[%s2072_s0 + $0xb8] sm:$0xff]  ;;  %v45_v44 = vld [vmem:[%s2072_s0 + $0xa8] sm:$0xff]  ;;  %v219_v46 = vsel %vm152_vm0, %v46_v43, 0.0  ;;  %v50_v48 = vld [vmem:[%s2072_s0 + $0xd0] sm:$0xff] }
   0xc   :  { %157 = vadd.xlane.f32.xlu0 %v156_v11  ;;  %v222_v45 = vsel %vm152_vm0, %v47_v42, 0.0  ;;  %v216_v47 = vsel %vm152_vm0, %v45_v44, 0.0  ;;  %v49_v49 = vld [vmem:[%s2072_s0 + $0xc8] sm:$0xff]  ;;  %v48_v50 = vld [vmem:[%s2072_s0 + $0xc0] sm:$0xff]  ;;  %v231_v51 = vsel %vm152_vm0, %v50_v48, 0.0  ;;  %v51_v56 = vld [vmem:[%s2072_s0 + $0xd8] sm:$0xff] }
   0xd   :  { %v228_v52 = vsel %vm152_vm0, %v49_v49, 0.0  ;;  %v225_v53 = vsel %vm152_vm0, %v48_v50, 0.0  ;;  %v53_v54 = vld [vmem:[%s2072_s0 + $0xe8] sm:$0xff]  ;;  %v52_v55 = vld [vmem:[%s2072_s0 + $0xe0] sm:$0xff]  ;;  %v234_v59 = vsel %vm152_vm0, %v51_v56, 0.0  ;;  %v55_v61 = vld [vmem:[%s2072_s0 + $0xf8] sm:$0xff] }
   0xe   :  { %v240_v57 = vsel %vm152_vm0, %v53_v54, 0.0  ;;  %v237_v58 = vsel %vm152_vm0, %v52_v55, 0.0  ;;  %v56_v60 = vld [vmem:[%s2072_s0 + $0x100] sm:$0xff]  ;;  %v54_v62 = vld [vmem:[%s2072_s0 + $0xf0] sm:$0xff]  ;;  %v246_v0 = vsel %vm152_vm0, %v55_v61, 0.0  ;;  %v59_v2 = vld [vmem:[%s2072_s0 + $0x118] sm:$0xff] }
   0xf   :  { %v249_v63 = vsel %vm152_vm0, %v56_v60, 0.0  ;;  %v243_v1 = vsel %vm152_vm0, %v54_v62, 0.0  ;;  %v58_v3 = vld [vmem:[%s2072_s0 + $0x110] sm:$0xff]  ;;  %v57_v4 = vld [vmem:[%s2072_s0 + $0x108] sm:$0xff]  ;;  %v258_v5 = vsel %vm152_vm0, %v59_v2, 0.0  ;;  %v60_v10 = vld [vmem:[%s2072_s0 + $0x120] sm:$0xff] }
  0x10   :  { %v255_v6 = vsel %vm152_vm0, %v58_v3, 0.0  ;;  %v252_v7 = vsel %vm152_vm0, %v57_v4, 0.0  ;;  %v62_v8 = vld [vmem:[%s2072_s0 + $0x130] sm:$0xff]  ;;  %v61_v9 = vld [vmem:[%s2072_s0 + $0x128] sm:$0xff]  ;;  %v261_v13 = vsel %vm152_vm0, %v60_v10, 0.0  ;;  %v68_v20 = vld [vmem:[%s2072_s0 + $0x160] sm:$0xff] }
  0x11   :  { %v267_v11 = vsel %vm152_vm0, %v62_v8, 0.0  ;;  %v264_v12 = vsel %vm152_vm0, %v61_v9, 0.0  ;;  %v65_v14 = vld [vmem:[%s2072_s0 + $0x148] sm:$0xff]  ;;  %vm711_vm3 = vcmask 261312   ;;  %vm715_vm4 = vcmask 326912   ;;  %s1075_s6 = smov [#allocation2]  }
  0x12   :  { %v69_v31 = vld [vmem:[%s2072_s0 + $0x168] sm:$0xff]  ;;  %vm719_vm5 = vcmask 392512   ;;  %vm723_vm6 = vcmask 458112   ;;  %vm727_vm7 = vcmask 523712   ;;  %vm731_vm8 = vcmask 589312   ;;  %s1036_s7 = sshll.u32 %s1075_s6, 4  ;;  %s1037_s7 = int_to_ptr.vmem [resolvable:$true] %s1036_s7 }
  0x13   :  { %178 = vadd.xlane.f32.xlu2 %v177_v15  ;;  %175 = vadd.xlane.f32.xlu1 %v174_v16  ;;  %v64_v15 = vld [vmem:[%s2072_s0 + $0x140] sm:$0xff]  ;;  %v63_v16 = vld [vmem:[%s2072_s0 + $0x138] sm:$0xff]  ;;  %v288_v36 = vsel %vm152_vm0, %v69_v31, 0.0  ;;  %vm735_vm9 = vcmask 654912   ;;  %vm739_vm10 = vcmask 720512   ;;  %vm2077_vm11 = vcmask 786112  }
  0x14   :  { %172 = vadd.xlane.f32.xlu0 %v171_v17  ;;  %v276_v17 = vsel %vm152_vm0, %v65_v14, 0.0  ;;  %v273_v18 = vsel %vm152_vm0, %v64_v15, 0.0  ;;  %v270_v19 = vsel %vm152_vm0, %v63_v16, 0.0  ;;  %vm2076_vm12 = vcmask 851712   ;;  %s1038_s10 = sshll.u32 %s2075_s3, 4  ;;  %s1039_s10 = int_to_ptr.hbm [resolvable:$true] %s1038_s10 }
  0x15   :  { %vm751_vm13 = vcmask 917312   ;;  %vm755_vm14 = vcmask 982912   ;;  %vm759_vm15 = vcmask 1048512  }
  0x1b   :  { %187 = vadd.xlane.f32.xlu2 %v186_v21  ;;  %184 = vadd.xlane.f32.xlu1 %v183_v22  ;;  %v67_v21 = vld [vmem:[%s2072_s0 + $0x158] sm:$0xff]  ;;  %v66_v22 = vld [vmem:[%s2072_s0 + $0x150] sm:$0xff] }
  0x1c   :  { %181 = vadd.xlane.f32.xlu0 %v180_v23  ;;  %v285_v23 = vsel %vm152_vm0, %v68_v20, 0.0  ;;  %v282_v24 = vsel %vm152_vm0, %v67_v21, 0.0  ;;  %v279_v25 = vsel %vm152_vm0, %v66_v22, 0.0  ;;  %v79_v20 = vld [vmem:[%s2072_s0 + $0x1b8] sm:$0xff] }
  0x23   :  { %196 = vadd.xlane.f32.xlu2 %v195_v27  ;;  %193 = vadd.xlane.f32.xlu1 %v192_v28  ;;  %v71_v27 = vld [vmem:[%s2072_s0 + $0x178] sm:$0xff]  ;;  %v70_v28 = vld [vmem:[%s2072_s0 + $0x170] sm:$0xff] }
  0x24   :  { %190 = vadd.xlane.f32.xlu0 %v189_v29 }
  0x2b   :  { %205 = vadd.xlane.f32.xlu2 %v204_v33  ;;  %202 = vadd.xlane.f32.xlu1 %v201_v34  ;;  %v294_v33 = vsel %vm152_vm0, %v71_v27, 0.0  ;;  %v291_v34 = vsel %vm152_vm0, %v70_v28, 0.0 }
  0x2c   :  { %199 = vadd.xlane.f32.xlu0 %v198_v35  ;;  %v1287_v35 = vand.u32 127, %v698_v26 }
  0x2e   :  { %v1291_v37 = vadd.s32 4294967288, %v1287_v35  ;;  %v1294_v38 = vadd.s32 4294967280, %v1287_v35  ;;  %v1306_v43 = vadd.s32 4294967272, %v1287_v35  ;;  %v1330_v61 = vadd.s32 4294967232, %v1287_v35 }
  0x2f   :  { %v1333_v62 = vadd.s32 4294967248, %v1287_v35  ;;  %v1355_v15 = vadd.s32 4294967216, %v1287_v35  ;;  %v1358_v16 = vadd.s32 4294967208, %v1287_v35 }
  0x33   :  { %214 = vadd.xlane.f32.xlu2 %v213_v39  ;;  %211 = vadd.xlane.f32.xlu1 %v210_v40  ;;  %v74_v39 = vld [vmem:[%s2072_s0 + $0x190] sm:$0xff]  ;;  %v73_v40 = vld [vmem:[%s2072_s0 + $0x188] sm:$0xff] }
  0x34   :  { %208 = vadd.xlane.f32.xlu0 %v207_v41  ;;  %v1303_v41 = vadd.s32 4294967256, %v1287_v35  ;;  %v303_v50 = vsel %vm152_vm0, %v74_v39, 0.0  ;;  %v1389_v39 = vadd.s32 4294967200, %v1287_v35 }
  0x3b   :  { %223 = vadd.xlane.f32.xlu2 %v222_v45  ;;  %220 = vadd.xlane.f32.xlu1 %v219_v46  ;;  %v72_v45 = vld [vmem:[%s2072_s0 + $0x180] sm:$0xff]  ;;  %v1312_v46 = vadd.s32 4294967264, %v1287_v35 }
  0x3c   :  { %217 = vadd.xlane.f32.xlu0 %v216_v47 }
  0x43   :  { %232 = vadd.xlane.f32.xlu2 %v231_v51  ;;  %229 = vadd.xlane.f32.xlu1 %v228_v52  ;;  %v300_v51 = vsel %vm152_vm0, %v73_v40, 0.0  ;;  %v83_v40 = vld [vmem:[%s2072_s0 + $0x1d8] sm:$0xff] }
  0x44   :  { %226 = vadd.xlane.f32.xlu0 %v225_v53  ;;  %v297_v53 = vsel %vm152_vm0, %v72_v45, 0.0 }
  0x4b   :  { %241 = vadd.xlane.f32.xlu2 %v240_v57  ;;  %238 = vadd.xlane.f32.xlu1 %v237_v58 }
  0x4c   :  { %235 = vadd.xlane.f32.xlu0 %v234_v59  ;;  %v1326_v59 = vadd.s32 4294967240, %v1287_v35 }
  0x53   :  { %250 = vadd.xlane.f32.xlu2 %v249_v63  ;;  %247 = vadd.xlane.f32.xlu1 %v246_v0  ;;  %v77_v0 = vld [vmem:[%s2072_s0 + $0x1a8] sm:$0xff] }
  0x54   :  { %244 = vadd.xlane.f32.xlu0 %v243_v1  ;;  %v76_v1 = vld [vmem:[%s2072_s0 + $0x1a0] sm:$0xff]  ;;  %v312_v10 = vsel %vm152_vm0, %v77_v0, 0.0 }
  0x5b   :  { %259 = vadd.xlane.f32.xlu2 %v258_v5  ;;  %256 = vadd.xlane.f32.xlu1 %v255_v6  ;;  %v75_v5 = vld [vmem:[%s2072_s0 + $0x198] sm:$0xff] }
  0x5c   :  { %253 = vadd.xlane.f32.xlu0 %v252_v7 }
  0x63   :  { %268 = vadd.xlane.f32.xlu2 %v267_v11  ;;  %265 = vadd.xlane.f32.xlu1 %v264_v12  ;;  %v309_v11 = vsel %vm152_vm0, %v76_v1, 0.0  ;;  %v306_v12 = vsel %vm152_vm0, %v75_v5, 0.0 }
  0x64   :  { %262 = vadd.xlane.f32.xlu0 %v261_v13 }
  0x6b   :  { %277 = vadd.xlane.f32.xlu2 %v276_v17  ;;  %274 = vadd.xlane.f32.xlu1 %v273_v18  ;;  %v1362_v18 = vadd.s32 4294967224, %v1287_v35 }
  0x6c   :  { %271 = vadd.xlane.f32.xlu0 %v270_v19  ;;  %v80_v19 = vld [vmem:[%s2072_s0 + $0x1c0] sm:$0xff] }
  0x6d   :  { %v321_v28 = vsel %vm152_vm0, %v80_v19, 0.0  ;;  %v87_v19 = vld [vmem:[%s2072_s0 + $0x1f8] sm:$0xff] }
  0x73   :  { %286 = vadd.xlane.f32.xlu2 %v285_v23  ;;  %283 = vadd.xlane.f32.xlu1 %v282_v24  ;;  %v78_v23 = vld [vmem:[%s2072_s0 + $0x1b0] sm:$0xff] }
  0x74   :  { %280 = vadd.xlane.f32.xlu0 %v279_v25 }
  0x76   :  { %v167_v29 = vpop.xlane.xlu2 %166  ;;  %v161_v30 = vpop.xlane.xlu1 %160 }
  0x77   :  { %v155_v32 = vpop.xlane.xlu0 %154  ;;  %v706_v52 = vperm.slane %v161_v30, %v1294_v38  ;;  %v714_v57 = vperm.slane %v167_v29, %v1312_v46  ;;  %v318_v29 = vsel %vm152_vm0, %v79_v20, 0.0  ;;  %v315_v30 = vsel %vm152_vm0, %v78_v23, 0.0 }
  0x78   :  { %v700_v48 = vperm.slane %v155_v32, %v1287_v35 }
  0x7b   :  { %295 = vadd.xlane.f32.xlu2 %v294_v33  ;;  %292 = vadd.xlane.f32.xlu1 %v291_v34  ;;  %v1382_v33 = vadd.s32 4294967192, %v1287_v35  ;;  %v1385_v34 = vadd.s32 4294967184, %v1287_v35 }
  0x7c   :  { %289 = vadd.xlane.f32.xlu0 %v288_v36 }
  0x7e   :  { %v170_v42 = vpop.xlane.xlu2 %169  ;;  %v164_v44 = vpop.xlane.xlu1 %163 }
  0x7f   :  { %v158_v47 = vpop.xlane.xlu0 %157  ;;  %v718_v54 = vperm.slane %v170_v42, %v1303_v41  ;;  %v710_v55 = vperm.slane %v164_v44, %v1306_v43  ;;  %v82_v42 = vld [vmem:[%s2072_s0 + $0x1d0] sm:$0xff] }
  0x80   :  { %v702_v49 = vperm.slane %v158_v47, %v1291_v37  ;;  %v81_v47 = vld [vmem:[%s2072_s0 + $0x1c8] sm:$0xff] }
  0x82   :  { %v704_v56 = vsel %vm703_vm1, %v702_v49, %v700_v48 }
  0x83   :  { %v708_v58 = vsel %vm707_vm2, %v706_v52, %v704_v56  ;;  %304 = vadd.xlane.f32.xlu2 %v303_v50  ;;  %301 = vadd.xlane.f32.xlu1 %v300_v51  ;;  %v330_v52 = vsel %vm152_vm0, %v83_v40, 0.0  ;;  %v104_v40 = vld [vmem:[%s2072_s0 + $0x280] sm:$0xff] }
  0x84   :  { %v712_v60 = vsel %vm711_vm3, %v710_v55, %v708_v58  ;;  %298 = vadd.xlane.f32.xlu0 %v297_v53  ;;  %v327_v53 = vsel %vm152_vm0, %v82_v42, 0.0  ;;  %v1410_v58 = vadd.s32 4294967176, %v1287_v35 }
  0x85   :  { %v716_v63 = vsel %vm715_vm4, %v714_v57, %v712_v60  ;;  %v86_v60 = vld [vmem:[%s2072_s0 + $0x1f0] sm:$0xff] }
  0x86   :  { %v179_v2 = vpop.xlane.xlu2 %178  ;;  %v176_v3 = vpop.xlane.xlu1 %175  ;;  %v720_v4 = vsel %vm719_vm5, %v718_v54, %v716_v63  ;;  %v324_v54 = vsel %vm152_vm0, %v81_v47, 0.0  ;;  %v85_v63 = vld [vmem:[%s2072_s0 + $0x1e8] sm:$0xff] }
  0x87   :  { %v726_v6 = vperm.slane %v176_v3, %v1326_v59  ;;  %v173_v7 = vpop.xlane.xlu0 %172  ;;  %v730_v8 = vperm.slane %v179_v2, %v1330_v61  ;;  %v84_v2 = vld [vmem:[%s2072_s0 + $0x1e0] sm:$0xff] }
  0x88   :  { %v722_v9 = vperm.slane %v173_v7, %v1333_v62  ;;  %v339_v7 = vsel %vm152_vm0, %v86_v60, 0.0  ;;  %v106_v60 = vld [vmem:[%s2072_s0 + $0x290] sm:$0xff] }
  0x8a   :  { %v724_v13 = vsel %vm723_vm6, %v722_v9, %v720_v4 }
  0x8b   :  { %v728_v14 = vsel %vm727_vm7, %v726_v6, %v724_v13  ;;  %313 = vadd.xlane.f32.xlu2 %v312_v10  ;;  %310 = vadd.xlane.f32.xlu1 %v309_v11  ;;  %v333_v10 = vsel %vm152_vm0, %v84_v2, 0.0  ;;  %v88_v13 = vld [vmem:[%s2072_s0 + $0x200] sm:$0xff] }
  0x8c   :  { %307 = vadd.xlane.f32.xlu0 %v306_v12  ;;  %v732_v17 = vsel %vm731_vm8, %v730_v8, %v728_v14  ;;  %v336_v8 = vsel %vm152_vm0, %v85_v63, 0.0  ;;  %v89_v12 = vld [vmem:[%s2072_s0 + $0x208] sm:$0xff] }
  0x8e   :  { %v188_v21 = vpop.xlane.xlu2 %187  ;;  %v185_v22 = vpop.xlane.xlu1 %184 }
  0x8f   :  { %v738_v24 = vperm.slane %v185_v22, %v1355_v15  ;;  %v182_v25 = vpop.xlane.xlu0 %181  ;;  %v742_v26 = vperm.slane %v188_v21, %v1358_v16 }
  0x90   :  { %v734_v27 = vperm.slane %v182_v25, %v1362_v18  ;;  %v345_v25 = vsel %vm152_vm0, %v88_v13, 0.0 }
  0x92   :  { %v736_v31 = vsel %vm735_vm9, %v734_v27, %v732_v17 }
  0x93   :  { %v740_v32 = vsel %vm739_vm10, %v738_v24, %v736_v31  ;;  %322 = vadd.xlane.f32.xlu2 %v321_v28  ;;  %319 = vadd.xlane.f32.xlu1 %v318_v29  ;;  %v348_v24 = vsel %vm152_vm0, %v89_v12, 0.0  ;;  %v105_v31 = vld [vmem:[%s2072_s0 + $0x288] sm:$0xff] }
  0x94   :  { %316 = vadd.xlane.f32.xlu0 %v315_v30  ;;  %v744_v36 = vsel %vm2077_vm11, %v742_v26, %v740_v32  ;;  %v342_v26 = vsel %vm152_vm0, %v87_v19, 0.0  ;;  %v90_v30 = vld [vmem:[%s2072_s0 + $0x210] sm:$0xff] }
  0x96   :  { %v197_v44 = vpop.xlane.xlu2 %196  ;;  %v194_v45 = vpop.xlane.xlu1 %193 }
  0x97   :  { %v750_v48 = vperm.slane %v194_v45, %v1382_v33  ;;  %v191_v49 = vpop.xlane.xlu0 %190  ;;  %v754_v50 = vperm.slane %v197_v44, %v1385_v34 }
  0x98   :  { %v746_v51 = vperm.slane %v191_v49, %v1389_v39  ;;  %v396_v49 = vsel %vm152_vm0, %v105_v31, 0.0 }
  0x9a   :  { %v748_v55 = vsel %vm2076_vm12, %v746_v51, %v744_v36 }
  0x9b   :  { %v752_v56 = vsel %vm751_vm13, %v750_v48, %v748_v55  ;;  %331 = vadd.xlane.f32.xlu2 %v330_v52  ;;  %328 = vadd.xlane.f32.xlu1 %v327_v53  ;;  %v351_v48 = vsel %vm152_vm0, %v90_v30, 0.0  ;;  %v120_v55 = vld [vmem:[%s2072_s0 + $0x300] sm:$0xff] }
  0x9c   :  { %325 = vadd.xlane.f32.xlu0 %v324_v54  ;;  %v756_v57 = vsel %vm755_vm14, %v754_v50, %v752_v56  ;;  %v393_v50 = vsel %vm152_vm0, %v104_v40, 0.0  ;;  %v121_v54 = vld [vmem:[%s2072_s0 + $0x308] sm:$0xff] }
  0x9e   :  { %v206_v0 = vpop.xlane.xlu2 %205  ;;  %v203_v1 = vpop.xlane.xlu1 %202 }
  0x9f   :  { %v762_v3 = vperm.slane %v206_v0, %v1291_v37  ;;  %v761_v4 = vperm.slane %v203_v1, %v1287_v35  ;;  %v200_v5 = vpop.xlane.xlu0 %199 }
  0xa0   :  { %v758_v6 = vperm.slane %v200_v5, %v1410_v58  ;;  %v399_v5 = vsel %vm152_vm0, %v106_v60, 0.0 }
  0xa1   :  { %v763_v9 = vsel %vm703_vm1, %v762_v3, %v761_v4  ;;  %v444_v3 = vsel %vm152_vm0, %v121_v54, 0.0  ;;  %v441_v4 = vsel %vm152_vm0, %v120_v55, 0.0  ;;  %v92_v55 = vld [vmem:[%s2072_s0 + $0x220] sm:$0xff] }
  0xa2   :  { %v1429_v11 = vsel %vm759_vm15, %v758_v6, %v756_v57 }
  0xa3   :  { %340 = vadd.xlane.f32.xlu2 %v339_v7  ;;  %337 = vadd.xlane.f32.xlu1 %v336_v8 }
  0xa4   :  { %334 = vadd.xlane.f32.xlu0 %v333_v10  ;;  %v137_v10 = vld [vmem:[%s2072_s0 + $0x388] sm:$0xff] }
  0xa6   :  { %v215_v14 = vpop.xlane.xlu2 %214  ;;  %v212_v17 = vpop.xlane.xlu1 %211 }
  0xa7   :  { %v766_v20 = vperm.slane %v212_v17, %v1306_v43  ;;  %v209_v21 = vpop.xlane.xlu0 %208  ;;  %v768_v22 = vperm.slane %v215_v14, %v1312_v46  ;;  %v136_v14 = vld [vmem:[%s2072_s0 + $0x380] sm:$0xff] }
  0xa8   :  { %v764_v23 = vperm.slane %v209_v21, %v1294_v38 }
  0xaa   :  { %v765_v27 = vsel %vm707_vm2, %v764_v23, %v763_v9  ;;  %v91_v9 = vld [vmem:[%s2072_s0 + $0x218] sm:$0xff]  ;;  %v492_v23 = vsel %vm152_vm0, %v137_v10, 0.0 }
  0xab   :  { %v767_v28 = vsel %vm711_vm3, %v766_v20, %v765_v27  ;;  %349 = vadd.xlane.f32.xlu2 %v348_v24  ;;  %346 = vadd.xlane.f32.xlu1 %v345_v25  ;;  %v489_v24 = vsel %vm152_vm0, %v136_v14, 0.0  ;;  %v139_v10 = vld [vmem:[%s2072_s0 + $0x398] sm:$0xff] }
  0xac   :  { %343 = vadd.xlane.f32.xlu0 %v342_v26  ;;  %v769_v29 = vsel %vm715_vm4, %v768_v22, %v767_v28  ;;  %v354_v22 = vsel %vm152_vm0, %v91_v9, 0.0  ;;  %v138_v28 = vld [vmem:[%s2072_s0 + $0x390] sm:$0xff] }
  0xae   :  { %v224_v32 = vpop.xlane.xlu2 %223  ;;  %v221_v36 = vpop.xlane.xlu1 %220 }
  0xaf   :  { %v772_v42 = vperm.slane %v221_v36, %v1333_v62  ;;  %v218_v44 = vpop.xlane.xlu0 %217  ;;  %v774_v45 = vperm.slane %v224_v32, %v1326_v59  ;;  %v107_v32 = vld [vmem:[%s2072_s0 + $0x298] sm:$0xff] }
  0xb0   :  { %v770_v47 = vperm.slane %v218_v44, %v1303_v41  ;;  %v495_v44 = vsel %vm152_vm0, %v138_v28, 0.0 }
  0xb2   :  { %v771_v51 = vsel %vm719_vm5, %v770_v47, %v769_v29  ;;  %v122_v29 = vld [vmem:[%s2072_s0 + $0x310] sm:$0xff]  ;;  %v402_v47 = vsel %vm152_vm0, %v107_v32, 0.0 }
  0xb3   :  { %v773_v52 = vsel %vm723_vm6, %v772_v42, %v771_v51  ;;  %352 = vadd.xlane.f32.xlu2 %v351_v48  ;;  %397 = vadd.xlane.f32.xlu1 %v396_v49  ;;  %v108_v51 = vld [vmem:[%s2072_s0 + $0x2a0] sm:$0xff] }
  0xb4   :  { %394 = vadd.xlane.f32.xlu0 %v393_v50  ;;  %v775_v53 = vsel %vm727_vm7, %v774_v45, %v773_v52  ;;  %v447_v45 = vsel %vm152_vm0, %v122_v29, 0.0  ;;  %v123_v50 = vld [vmem:[%s2072_s0 + $0x318] sm:$0xff]  ;;  %v124_v29 = vld [vmem:[%s2072_s0 + $0x320] sm:$0xff] }
  0xb6   :  { %v233_v56 = vpop.xlane.xlu2 %232  ;;  %v230_v57 = vpop.xlane.xlu1 %229 }
  0xb7   :  { %v778_v63 = vperm.slane %v230_v57, %v1362_v18  ;;  %v227_v0 = vpop.xlane.xlu0 %226  ;;  %v780_v1 = vperm.slane %v233_v56, %v1355_v15 }
  0xb8   :  { %v776_v2 = vperm.slane %v227_v0, %v1330_v61  ;;  %v450_v0 = vsel %vm152_vm0, %v123_v50, 0.0  ;;  %v141_v50 = vld [vmem:[%s2072_s0 + $0x3a8] sm:$0xff] }
  0xba   :  { %v777_v6 = vsel %vm731_vm8, %v776_v2, %v775_v53  ;;  %v357_v2 = vsel %vm152_vm0, %v92_v55, 0.0 }
  0xbb   :  { %v779_v7 = vsel %vm735_vm9, %v778_v63, %v777_v6  ;;  %445 = vadd.xlane.f32.xlu2 %v444_v3  ;;  %442 = vadd.xlane.f32.xlu1 %v441_v4  ;;  %v109_v6 = vld [vmem:[%s2072_s0 + $0x2a8] sm:$0xff] }
  0xbc   :  { %400 = vadd.xlane.f32.xlu0 %v399_v5  ;;  %v781_v8 = vsel %vm739_vm10, %v780_v1, %v779_v7  ;;  %v405_v1 = vsel %vm152_vm0, %v108_v51, 0.0  ;;  %v93_v7 = vld [vmem:[%s2072_s0 + $0x228] sm:$0xff] }
  0xbd   :  { %v125_v51 = vld [vmem:[%s2072_s0 + $0x328] sm:$0xff] }
  0xbe   :  { %v242_v12 = vpop.xlane.xlu2 %241  ;;  %v239_v13 = vpop.xlane.xlu1 %238 }
  0xbf   :  { %v784_v17 = vperm.slane %v239_v13, %v1389_v39  ;;  %v236_v19 = vpop.xlane.xlu0 %235  ;;  %v786_v20 = vperm.slane %v242_v12, %v1382_v33 }
  0xc0   :  { %v782_v21 = vperm.slane %v236_v19, %v1358_v16  ;;  %v408_v19 = vsel %vm152_vm0, %v109_v6, 0.0  ;;  %v111_v6 = vld [vmem:[%s2072_s0 + $0x2b8] sm:$0xff] }
  0xc2   :  { %v783_v25 = vsel %vm2077_vm11, %v782_v21, %v781_v8  ;;  %v498_v21 = vsel %vm152_vm0, %v139_v10, 0.0 }
  0xc3   :  { %v785_v26 = vsel %vm2076_vm12, %v784_v17, %v783_v25  ;;  %355 = vadd.xlane.f32.xlu2 %v354_v22  ;;  %493 = vadd.xlane.f32.xlu1 %v492_v23  ;;  %v94_v25 = vld [vmem:[%s2072_s0 + $0x230] sm:$0xff] }
  0xc4   :  { %490 = vadd.xlane.f32.xlu0 %v489_v24  ;;  %v787_v27 = vsel %vm751_vm13, %v786_v20, %v785_v26  ;;  %v360_v20 = vsel %vm152_vm0, %v93_v7, 0.0  ;;  %v140_v26 = vld [vmem:[%s2072_s0 + $0x3a0] sm:$0xff] }
  0xc6   :  { %v251_v30 = vpop.xlane.xlu2 %250  ;;  %v248_v31 = vpop.xlane.xlu1 %247 }
  0xc7   :  { %v790_v36 = vperm.slane %v248_v31, %v1410_v58  ;;  %v245_v40 = vpop.xlane.xlu0 %244  ;;  %v792_v52 = vperm.slane %v251_v30, %v1287_v35 }
  0xc8   :  { %v788_v42 = vperm.slane %v245_v40, %v1385_v34  ;;  %v363_v40 = vsel %vm152_vm0, %v94_v25, 0.0  ;;  %v96_v25 = vld [vmem:[%s2072_s0 + $0x240] sm:$0xff] }
  0xca   :  { %v789_v48 = vsel %vm755_vm14, %v788_v42, %v787_v27  ;;  %v501_v42 = vsel %vm152_vm0, %v140_v26, 0.0 }
  0xcb   :  { %496 = vadd.xlane.f32.xlu2 %v495_v44  ;;  %448 = vadd.xlane.f32.xlu1 %v447_v45  ;;  %v1519_v49 = vsel %vm759_vm15, %v790_v36, %v789_v48  ;;  %v453_v44 = vsel %vm152_vm0, %v124_v29, 0.0  ;;  %v142_v29 = vld [vmem:[%s2072_s0 + $0x3b0] sm:$0xff] }
  0xcc   :  { %403 = vadd.xlane.f32.xlu0 %v402_v47 }
  0xce   :  { %v260_v53 = vpop.xlane.xlu2 %259  ;;  %v257_v54 = vpop.xlane.xlu1 %256 }
  0xcf   :  { %v795_v56 = vperm.slane %v257_v54, %v1294_v38  ;;  %v254_v57 = vpop.xlane.xlu0 %253  ;;  %v797_v60 = vperm.slane %v260_v53, %v1306_v43  ;;  %v110_v54 = vld [vmem:[%s2072_s0 + $0x2b0] sm:$0xff] }
  0xd0   :  { %v793_v63 = vperm.slane %v254_v57, %v1291_v37 }
  0xd2   :  { %v794_v3 = vsel %vm703_vm1, %v793_v63, %v792_v52  ;;  %v504_v63 = vsel %vm152_vm0, %v141_v50, 0.0 }
  0xd3   :  { %v796_v4 = vsel %vm707_vm2, %v795_v56, %v794_v3  ;;  %451 = vadd.xlane.f32.xlu2 %v450_v0  ;;  %406 = vadd.xlane.f32.xlu1 %v405_v1  ;;  %v456_v0 = vsel %vm152_vm0, %v125_v51, 0.0  ;;  %v411_v1 = vsel %vm152_vm0, %v110_v54, 0.0 }
  0xd4   :  { %358 = vadd.xlane.f32.xlu0 %v357_v2  ;;  %v798_v5 = vsel %vm711_vm3, %v797_v60, %v796_v4 }
  0xd6   :  { %v269_v8 = vpop.xlane.xlu2 %268  ;;  %v266_v9 = vpop.xlane.xlu1 %265 }
  0xd7   :  { %v801_v12 = vperm.slane %v266_v9, %v1303_v41  ;;  %v263_v13 = vpop.xlane.xlu0 %262  ;;  %v803_v14 = vperm.slane %v269_v8, %v1333_v62  ;;  %v95_v9 = vld [vmem:[%s2072_s0 + $0x238] sm:$0xff] }
  0xd8   :  { %v799_v17 = vperm.slane %v263_v13, %v1312_v46 }
  0xda   :  { %v800_v22 = vsel %vm715_vm4, %v799_v17, %v798_v5  ;;  %v126_v5 = vld [vmem:[%s2072_s0 + $0x330] sm:$0xff] }
  0xdb   :  { %v802_v23 = vsel %vm719_vm5, %v801_v12, %v800_v22  ;;  %409 = vadd.xlane.f32.xlu2 %v408_v19  ;;  %361 = vadd.xlane.f32.xlu1 %v360_v20  ;;  %v459_v17 = vsel %vm152_vm0, %v126_v5, 0.0  ;;  %v414_v19 = vsel %vm152_vm0, %v111_v6, 0.0  ;;  %v366_v20 = vsel %vm152_vm0, %v95_v9, 0.0 }
  0xdc   :  { %499 = vadd.xlane.f32.xlu0 %v498_v21  ;;  %v804_v24 = vsel %vm723_vm6, %v803_v14, %v802_v23 }
  0xde   :  { %v278_v27 = vpop.xlane.xlu2 %277  ;;  %v275_v28 = vpop.xlane.xlu1 %274 }
  0xdf   :  { %v807_v30 = vperm.slane %v275_v28, %v1330_v61  ;;  %v272_v31 = vpop.xlane.xlu0 %271  ;;  %v809_v32 = vperm.slane %v278_v27, %v1362_v18 }
  0xe0   :  { %v805_v36 = vperm.slane %v272_v31, %v1326_v59 }
  0xe2   :  { %v806_v45 = vsel %vm727_vm7, %v805_v36, %v804_v24  ;;  %v112_v24 = vld [vmem:[%s2072_s0 + $0x2c0] sm:$0xff] }
  0xe3   :  { %v808_v47 = vsel %vm731_vm8, %v807_v30, %v806_v45  ;;  %364 = vadd.xlane.f32.xlu2 %v363_v40  ;;  %502 = vadd.xlane.f32.xlu1 %v501_v42  ;;  %v417_v40 = vsel %vm152_vm0, %v112_v24, 0.0  ;;  %v369_v42 = vsel %vm152_vm0, %v96_v25, 0.0 }
  0xe4   :  { %454 = vadd.xlane.f32.xlu0 %v453_v44  ;;  %v810_v48 = vsel %vm735_vm9, %v809_v32, %v808_v47  ;;  %v97_v47 = vld [vmem:[%s2072_s0 + $0x248] sm:$0xff] }
  0xe6   :  { %v287_v52 = vpop.xlane.xlu2 %286  ;;  %v284_v53 = vpop.xlane.xlu1 %283 }
  0xe7   :  { %v813_v55 = vperm.slane %v284_v53, %v1358_v16  ;;  %v281_v56 = vpop.xlane.xlu0 %280  ;;  %v815_v57 = vperm.slane %v287_v52, %v1389_v39  ;;  %v127_v52 = vld [vmem:[%s2072_s0 + $0x338] sm:$0xff] }
  0xe8   :  { %v811_v60 = vperm.slane %v281_v56, %v1355_v15 }
  0xea   :  { %v812_v2 = vsel %vm739_vm10, %v811_v60, %v810_v48  ;;  %v143_v48 = vld [vmem:[%s2072_s0 + $0x3b8] sm:$0xff] }
  0xeb   :  { %v814_v3 = vsel %vm2077_vm11, %v813_v55, %v812_v2  ;;  %505 = vadd.xlane.f32.xlu2 %v504_v63  ;;  %457 = vadd.xlane.f32.xlu1 %v456_v0  ;;  %v510_v60 = vsel %vm152_vm0, %v143_v48, 0.0  ;;  %v462_v63 = vsel %vm152_vm0, %v127_v52, 0.0 }
  0xec   :  { %412 = vadd.xlane.f32.xlu0 %v411_v1  ;;  %v816_v4 = vsel %vm2076_vm12, %v815_v57, %v814_v3  ;;  %vm978_vm12 = vcmask 1041409   ;;  %v372_v57 = vsel %vm152_vm0, %v97_v47, 0.0  ;;  %v144_v3 = vld [vmem:[%s2072_s0 + $0x3c0] sm:$0xff]  ;;  %v99_v47 = vld [vmem:[%s2072_s0 + $0x258] sm:$0xff] }
  0xee   :  { %v296_v7 = vpop.xlane.xlu2 %295  ;;  %v293_v8 = vpop.xlane.xlu1 %292 }
  0xef   :  { %v819_v10 = vperm.slane %v293_v8, %v1385_v34  ;;  %v290_v12 = vpop.xlane.xlu0 %289  ;;  %v821_v13 = vperm.slane %v296_v7, %v1410_v58  ;;  %v113_v7 = vld [vmem:[%s2072_s0 + $0x2c8] sm:$0xff] }
  0xf0   :  { %v817_v14 = vperm.slane %v290_v12, %v1382_v33 }
  0xf2   :  { %v818_v21 = vsel %vm751_vm13, %v817_v14, %v816_v4  ;;  %v128_v4 = vld [vmem:[%s2072_s0 + $0x340] sm:$0xff] }
  0xf3   :  { %v820_v22 = vsel %vm755_vm14, %v819_v10, %v818_v21  ;;  %460 = vadd.xlane.f32.xlu2 %v459_v17  ;;  %415 = vadd.xlane.f32.xlu1 %v414_v19  ;;  %v465_v14 = vsel %vm152_vm0, %v128_v4, 0.0  ;;  %v420_v17 = vsel %vm152_vm0, %v113_v7, 0.0 }
  0xf4   :  { %367 = vadd.xlane.f32.xlu0 %v366_v20  ;;  %v822_v23 = vsel %vm759_vm15, %v821_v13, %v820_v22  ;;  %v513_v13 = vsel %vm152_vm0, %v144_v3, 0.0  ;;  %v129_v22 = vld [vmem:[%s2072_s0 + $0x348] sm:$0xff]  ;;  %v146_v3 = vld [vmem:[%s2072_s0 + $0x3d0] sm:$0xff] }
  0xf5   :  { %v1620_v26 = vsel %vm978_vm12, %v822_v23, %v1429_v11  ;;  %v507_v11 = vsel %vm152_vm0, %v142_v29, 0.0  ;;  %v114_v23 = vld [vmem:[%s2072_s0 + $0x2d0] sm:$0xff] }
  0xf6   :  { %v305_v27 = vpop.xlane.xlu2 %304  ;;  %v302_v28 = vpop.xlane.xlu1 %301 }
  0xf7   :  { %v826_v30 = vperm.slane %v305_v27, %v1294_v38  ;;  %v824_v31 = vperm.slane %v302_v28, %v1291_v37  ;;  %v299_v32 = vpop.xlane.xlu0 %298  ;;  %v98_v27 = vld [vmem:[%s2072_s0 + $0x250] sm:$0xff] }
  0xf8   :  { %v823_v36 = vperm.slane %v299_v32, %v1287_v35  ;;  %v468_v32 = vsel %vm152_vm0, %v129_v22, 0.0  ;;  %v131_v22 = vld [vmem:[%s2072_s0 + $0x358] sm:$0xff] }
  0xfa   :  { %v825_v44 = vsel %vm703_vm1, %v824_v31, %v823_v36  ;;  %v423_v36 = vsel %vm152_vm0, %v114_v23, 0.0 }
  0xfb   :  { %418 = vadd.xlane.f32.xlu2 %v417_v40  ;;  %370 = vadd.xlane.f32.xlu1 %v369_v42  ;;  %v827_v45 = vsel %vm707_vm2, %v826_v30, %v825_v44  ;;  %v375_v40 = vsel %vm152_vm0, %v98_v27, 0.0 }
  0xfc   :  { %508 = vadd.xlane.f32.xlu0 %v507_v11 }
  0xfe   :  { %v314_v50 = vpop.xlane.xlu2 %313  ;;  %v311_v51 = vpop.xlane.xlu1 %310 }
  0xff   :  { %v830_v53 = vperm.slane %v311_v51, %v1312_v46  ;;  %v308_v54 = vpop.xlane.xlu0 %307  ;;  %v832_v55 = vperm.slane %v314_v50, %v1303_v41  ;;  %v145_v51 = vld [vmem:[%s2072_s0 + $0x3c8] sm:$0xff] }
 0x100   :  { %v828_v56 = vperm.slane %v308_v54, %v1306_v43 }
 0x102   :  { %v829_v0 = vsel %vm711_vm3, %v828_v56, %v827_v45  ;;  %v115_v45 = vld [vmem:[%s2072_s0 + $0x2d8] sm:$0xff] }
 0x103   :  { %v831_v1 = vsel %vm715_vm4, %v830_v53, %v829_v0  ;;  %373 = vadd.xlane.f32.xlu2 %v372_v57  ;;  %511 = vadd.xlane.f32.xlu1 %v510_v60  ;;  %v426_v56 = vsel %vm152_vm0, %v115_v45, 0.0  ;;  %v378_v57 = vsel %vm152_vm0, %v99_v47, 0.0  ;;  %v516_v60 = vsel %vm152_vm0, %v145_v51, 0.0  ;;  %v101_v47 = vld [vmem:[%s2072_s0 + $0x268] sm:$0xff] }
 0x104   :  { %463 = vadd.xlane.f32.xlu0 %v462_v63  ;;  %v833_v2 = vsel %vm719_vm5, %v832_v55, %v831_v1 }
 0x106   :  { %v323_v5 = vpop.xlane.xlu2 %322  ;;  %v320_v6 = vpop.xlane.xlu1 %319 }
 0x107   :  { %v836_v8 = vperm.slane %v320_v6, %v1326_v59  ;;  %v317_v9 = vpop.xlane.xlu0 %316  ;;  %v838_v10 = vperm.slane %v323_v5, %v1330_v61  ;;  %v130_v6 = vld [vmem:[%s2072_s0 + $0x350] sm:$0xff] }
 0x108   :  { %v834_v12 = vperm.slane %v317_v9, %v1333_v62 }
 0x10a   :  { %v835_v19 = vsel %vm723_vm6, %v834_v12, %v833_v2  ;;  %v100_v2 = vld [vmem:[%s2072_s0 + $0x260] sm:$0xff] }
 0x10b   :  { %v837_v20 = vsel %vm727_vm7, %v836_v8, %v835_v19  ;;  %514 = vadd.xlane.f32.xlu2 %v513_v13  ;;  %466 = vadd.xlane.f32.xlu1 %v465_v14  ;;  %v381_v12 = vsel %vm152_vm0, %v100_v2, 0.0  ;;  %v519_v13 = vsel %vm152_vm0, %v146_v3, 0.0  ;;  %v148_v2 = vld [vmem:[%s2072_s0 + $0x3e0] sm:$0xff] }
 0x10c   :  { %421 = vadd.xlane.f32.xlu0 %v420_v17  ;;  %v839_v21 = vsel %vm731_vm8, %v838_v10, %v837_v20  ;;  %v471_v17 = vsel %vm152_vm0, %v130_v6, 0.0 }
 0x10e   :  { %v332_v24 = vpop.xlane.xlu2 %331  ;;  %v329_v25 = vpop.xlane.xlu1 %328 }
 0x10f   :  { %v842_v28 = vperm.slane %v329_v25, %v1355_v15  ;;  %v326_v29 = vpop.xlane.xlu0 %325  ;;  %v844_v30 = vperm.slane %v332_v24, %v1358_v16  ;;  %v116_v25 = vld [vmem:[%s2072_s0 + $0x2e0] sm:$0xff] }
 0x110   :  { %v840_v31 = vperm.slane %v326_v29, %v1362_v18 }
 0x112   :  { %v841_v42 = vsel %vm735_vm9, %v840_v31, %v839_v21  ;;  %v147_v21 = vld [vmem:[%s2072_s0 + $0x3d8] sm:$0xff]  ;;  %v474_v31 = vsel %vm152_vm0, %v131_v22, 0.0 }
 0x113   :  { %v843_v11 = vsel %vm739_vm10, %v842_v28, %v841_v42  ;;  %469 = vadd.xlane.f32.xlu2 %v468_v32  ;;  %424 = vadd.xlane.f32.xlu1 %v423_v36  ;;  %v429_v36 = vsel %vm152_vm0, %v116_v25, 0.0  ;;  %v132_v42 = vld [vmem:[%s2072_s0 + $0x360] sm:$0xff] }
 0x114   :  { %376 = vadd.xlane.f32.xlu0 %v375_v40  ;;  %v845_v44 = vsel %vm2077_vm11, %v844_v30, %v843_v11  ;;  %vm2078_vm11 = vcmask 851712   ;;  %v522_v30 = vsel %vm152_vm0, %v147_v21, 0.0  ;;  %v117_v11 = vld [vmem:[%s2072_s0 + $0x2e8] sm:$0xff] }
 0x116   :  { %v341_v48 = vpop.xlane.xlu2 %340  ;;  %v338_v50 = vpop.xlane.xlu1 %337 }
 0x117   :  { %v848_v52 = vperm.slane %v338_v50, %v1382_v33  ;;  %v335_v53 = vpop.xlane.xlu0 %334  ;;  %v850_v54 = vperm.slane %v341_v48, %v1385_v34 }
 0x118   :  { %v846_v55 = vperm.slane %v335_v53, %v1389_v39  ;;  %v477_v53 = vsel %vm152_vm0, %v132_v42, 0.0 }
 0x11a   :  { %v847_v63 = vsel %vm2078_vm11, %v846_v55, %v845_v44 }
 0x11b   :  { %v849_v0 = vsel %vm751_vm13, %v848_v52, %v847_v63  ;;  %427 = vadd.xlane.f32.xlu2 %v426_v56  ;;  %379 = vadd.xlane.f32.xlu1 %v378_v57  ;;  %v384_v56 = vsel %vm152_vm0, %v101_v47, 0.0  ;;  %v102_v63 = vld [vmem:[%s2072_s0 + $0x270] sm:$0xff] }
 0x11c   :  { %517 = vadd.xlane.f32.xlu0 %v516_v60  ;;  %v851_v1 = vsel %vm755_vm14, %v850_v54, %v849_v0  ;;  %v432_v54 = vsel %vm152_vm0, %v117_v11, 0.0  ;;  %v118_v60 = vld [vmem:[%s2072_s0 + $0x2f0] sm:$0xff] }
 0x11e   :  { %v350_v4 = vpop.xlane.xlu2 %349  ;;  %v347_v5 = vpop.xlane.xlu1 %346 }
 0x11f   :  { %v855_v7 = vperm.slane %v350_v4, %v1291_v37  ;;  %v854_v8 = vperm.slane %v347_v5, %v1287_v35  ;;  %v344_v9 = vpop.xlane.xlu0 %343 }
 0x120   :  { %v852_v10 = vperm.slane %v344_v9, %v1410_v58 }
 0x121   :  { %v856_v14 = vsel %vm703_vm1, %v855_v7, %v854_v8  ;;  %v435_v7 = vsel %vm152_vm0, %v118_v60, 0.0  ;;  %v387_v8 = vsel %vm152_vm0, %v102_v63, 0.0 }
 0x122   :  { %v853_v19 = vsel %vm759_vm15, %v852_v10, %v851_v1  ;;  %v525_v10 = vsel %vm152_vm0, %v148_v2, 0.0 }
 0x123   :  { %382 = vadd.xlane.f32.xlu2 %v381_v12  ;;  %520 = vadd.xlane.f32.xlu1 %v519_v13  ;;  %v1724_v20 = vsel %vm978_vm12, %v853_v19, %v1519_v49 }
 0x124   :  { %472 = vadd.xlane.f32.xlu0 %v471_v17  ;;  %v133_v17 = vld [vmem:[%s2072_s0 + $0x368] sm:$0xff] }
 0x126   :  { %v353_v23 = vpop.xlane.xlu2 %352  ;;  %v398_v24 = vpop.xlane.xlu1 %397 }
 0x127   :  { %v857_v27 = vperm.slane %v353_v23, %v1294_v38  ;;  %v886_v49 = vperm.slane %v398_v24, %v1291_v37  ;;  %v395_v28 = vpop.xlane.xlu0 %394 }
 0x128   :  { %v885_v29 = vperm.slane %v395_v28, %v1287_v35  ;;  %v480_v28 = vsel %vm152_vm0, %v133_v17, 0.0 }
 0x129   :  { %v858_v32 = vsel %vm707_vm2, %v857_v27, %v856_v14 }
 0x12a   :  { %v887_v40 = vsel %vm703_vm1, %v886_v49, %v885_v29 }
 0x12b   :  { %523 = vadd.xlane.f32.xlu2 %v522_v30  ;;  %475 = vadd.xlane.f32.xlu1 %v474_v31  ;;  %v134_v30 = vld [vmem:[%s2072_s0 + $0x370] sm:$0xff] }
 0x12c   :  { %430 = vadd.xlane.f32.xlu0 %v429_v36  ;;  %v119_v36 = vld [vmem:[%s2072_s0 + $0x2f8] sm:$0xff]  ;;  %v483_v47 = vsel %vm152_vm0, %v134_v30, 0.0 }
 0x12e   :  { %v446_v44 = vpop.xlane.xlu2 %445  ;;  %v443_v45 = vpop.xlane.xlu1 %442 }
 0x12f   :  { %v917_v48 = vperm.slane %v446_v44, %v1291_v37  ;;  %v916_v50 = vperm.slane %v443_v45, %v1287_v35  ;;  %v401_v51 = vpop.xlane.xlu0 %400 }
 0x130   :  { %v888_v52 = vperm.slane %v401_v51, %v1294_v38  ;;  %v438_v51 = vsel %vm152_vm0, %v119_v36, 0.0 }
 0x131   :  { %v918_v55 = vsel %vm703_vm1, %v917_v48, %v916_v50 }
 0x132   :  { %v889_v57 = vsel %vm707_vm2, %v888_v52, %v887_v40 }
 0x133   :  { %478 = vadd.xlane.f32.xlu2 %v477_v53  ;;  %433 = vadd.xlane.f32.xlu1 %v432_v54  ;;  %v151_v53 = vld [vmem:[%s2072_s0 + $0x3f8] sm:$0xff] }
 0x134   :  { %385 = vadd.xlane.f32.xlu0 %v384_v56  ;;  %v135_v56 = vld [vmem:[%s2072_s0 + $0x378] sm:$0xff] }
 0x136   :  { %v356_v0 = vpop.xlane.xlu2 %355  ;;  %v494_v1 = vpop.xlane.xlu1 %493 }
 0x137   :  { %v859_v3 = vperm.slane %v356_v0, %v1306_v43  ;;  %v948_v4 = vperm.slane %v494_v1, %v1291_v37  ;;  %v491_v5 = vpop.xlane.xlu0 %490  ;;  %v103_v37 = vld [vmem:[%s2072_s0 + $0x278] sm:$0xff]  ;;  %v534_v1 = vsel %vm152_vm0, %v151_v53, 0.0 }
 0x138   :  { %v947_v6 = vperm.slane %v491_v5, %v1287_v35  ;;  %v149_v35 = vld [vmem:[%s2072_s0 + $0x3e8] sm:$0xff]  ;;  %v390_v24 = vsel %vm152_vm0, %v103_v37, 0.0 }
 0x139   :  { %v860_v9 = vsel %vm711_vm3, %v859_v3, %v858_v32  ;;  %v528_v25 = vsel %vm152_vm0, %v149_v35, 0.0 }
 0x13a   :  { %v949_v12 = vsel %vm703_vm1, %v948_v4, %v947_v6  ;;  %v486_v4 = vsel %vm152_vm0, %v135_v56, 0.0  ;;  %vm2080_vm1 = vmmov %vm2078_vm11 }
 0x13b   :  { %436 = vadd.xlane.f32.xlu2 %v435_v7  ;;  %388 = vadd.xlane.f32.xlu1 %v387_v8 }
 0x13c   :  { %526 = vadd.xlane.f32.xlu0 %v525_v10 }
 0x13e   :  { %v497_v13 = vpop.xlane.xlu2 %496  ;;  %v449_v14 = vpop.xlane.xlu1 %448 }
 0x13f   :  { %v950_v19 = vperm.slane %v497_v13, %v1294_v38  ;;  %v919_v21 = vperm.slane %v449_v14, %v1294_v38  ;;  %v404_v22 = vpop.xlane.xlu0 %403  ;;  %v150_v38 = vld [vmem:[%s2072_s0 + $0x3f0] sm:$0xff] }
 0x140   :  { %v890_v23 = vperm.slane %v404_v22, %v1306_v43  ;;  %v531_v45 = vsel %vm152_vm0, %v150_v38, 0.0  ;;  %vm2079_vm0 = vcmask 786112  }
 0x141   :  { %v951_v27 = vsel %vm707_vm2, %v950_v19, %v949_v12  ;;  %v920_v49 = vsel %vm707_vm2, %v919_v21, %v918_v55  ;;  %vm980_vm2 = vcmask 1042434  }
 0x142   :  { %v891_v29 = vsel %vm711_vm3, %v890_v23, %v889_v57 }
 0x143   :  { %391 = vadd.xlane.f32.xlu2 %v390_v24  ;;  %529 = vadd.xlane.f32.xlu1 %v528_v25 }
 0x144   :  { %481 = vadd.xlane.f32.xlu0 %v480_v28 }
 0x146   :  { %v452_v31 = vpop.xlane.xlu2 %451  ;;  %v407_v32 = vpop.xlane.xlu1 %406 }
 0x147   :  { %v921_v40 = vperm.slane %v452_v31, %v1306_v43  ;;  %v892_v42 = vperm.slane %v407_v32, %v1312_v46  ;;  %v359_v11 = vpop.xlane.xlu0 %358 }
 0x148   :  { %v861_v44 = vperm.slane %v359_v11, %v1312_v46 }
 0x149   :  { %v922_v48 = vsel %vm711_vm3, %v921_v40, %v920_v49  ;;  %v893_v50 = vsel %vm715_vm4, %v892_v42, %v891_v29 }
 0x14a   :  { %v862_v52 = vsel %vm715_vm4, %v861_v44, %v860_v9 }
 0x14b   :  { %532 = vadd.xlane.f32.xlu2 %v531_v45  ;;  %484 = vadd.xlane.f32.xlu1 %v483_v47 }
 0x14c   :  { %439 = vadd.xlane.f32.xlu0 %v438_v51 }
 0x14e   :  { %v410_v54 = vpop.xlane.xlu2 %409  ;;  %v362_v55 = vpop.xlane.xlu1 %361 }
 0x14f   :  { %v894_v57 = vperm.slane %v410_v54, %v1303_v41  ;;  %v863_v60 = vperm.slane %v362_v55, %v1303_v41  ;;  %v500_v63 = vpop.xlane.xlu0 %499 }
 0x150   :  { %v952_v0 = vperm.slane %v500_v63, %v1306_v43 }
 0x151   :  { %v895_v2 = vsel %vm719_vm5, %v894_v57, %v893_v50  ;;  %v864_v3 = vsel %vm719_vm5, %v863_v60, %v862_v52 }
 0x152   :  { %v953_v5 = vsel %vm711_vm3, %v952_v0, %v951_v27  ;;  %vm2081_vm3 = vmmov %vm2079_vm0 }
 0x153   :  { %535 = vadd.xlane.f32.xlu1 %v534_v1 }
 0x154   :  { %487 = vadd.xlane.f32.xlu0 %v486_v4 }
 0x156   :  { %v365_v6 = vpop.xlane.xlu2 %364  ;;  %v503_v7 = vpop.xlane.xlu1 %502 }
 0x157   :  { %v865_v8 = vperm.slane %v365_v6, %v1333_v62  ;;  %v954_v9 = vperm.slane %v503_v7, %v1312_v46  ;;  %v455_v10 = vpop.xlane.xlu0 %454  ;;  %v553_v7 = vld [vmem:[%s2073_s1 + $0x78] sm:$0xff] }
 0x158   :  { %v923_v43 = vperm.slane %v455_v10, %v1312_v46  ;;  %989 = vmatpush.msra.mxu0 %v553_v7  ;;  %v568_v10 = vld [vmem:[%s2073_s1 + $0xf0] sm:$0xff] }
 0x159   :  { %v866_v12 = vsel %vm723_vm6, %v865_v8, %v864_v3  ;;  %v955_v37 = vsel %vm715_vm4, %v954_v9, %v953_v5  ;;  %v569_v8 = vld [vmem:[%s2073_s1 + $0xf8] sm:$0xff]  ;;  %v552_v9 = vld [vmem:[%s2073_s1 + $0x70] sm:$0xff] }
 0x15a   :  { %v924_v35 = vsel %vm715_vm4, %v923_v43, %v922_v48  ;;  %1009 = vmatpush.msra.mxu1 %v569_v8  ;;  %990 = vmatpush.msra.mxu0 %v552_v9  ;;  %vm2082_vm4 = vmmov %vm2080_vm1 }
 0x15c   :  { %1010 = vmatpush.msra.mxu1 %v568_v10 }
 0x15e   :  { %v506_v13 = vpop.xlane.xlu2 %505  ;;  %v458_v14 = vpop.xlane.xlu1 %457 }
 0x15f   :  { %v956_v17 = vperm.slane %v506_v13, %v1303_v41  ;;  %v925_v19 = vperm.slane %v458_v14, %v1303_v41  ;;  %v413_v21 = vpop.xlane.xlu0 %412  ;;  %v567_v13 = vld [vmem:[%s2073_s1 + $0xe8] sm:$0xff]  ;;  %v550_v14 = vld [vmem:[%s2073_s1 + $0x60] sm:$0xff] }
 0x160   :  { %v896_v22 = vperm.slane %v413_v21, %v1333_v62  ;;  %1011 = vmatpush.msra.mxu1 %v567_v13  ;;  %v565_v21 = vld [vmem:[%s2073_s1 + $0xd8] sm:$0xff] }
 0x161   :  { %v957_v23 = vsel %vm719_vm5, %v956_v17, %v955_v37  ;;  %v926_v24 = vsel %vm719_vm5, %v925_v19, %v924_v35  ;;  %v551_v35 = vld [vmem:[%s2073_s1 + $0x68] sm:$0xff]  ;;  %v566_v17 = vld [vmem:[%s2073_s1 + $0xe0] sm:$0xff]  ;;  %v549_v19 = vld [vmem:[%s2073_s1 + $0x58] sm:$0xff] }
 0x162   :  { %v897_v46 = vsel %vm723_vm6, %v896_v22, %v895_v2  ;;  %991 = vmatpush.msra.mxu0 %v551_v35  ;;  %1012 = vmatpush.msra.mxu1 %v566_v17  ;;  %v548_v22 = vld [vmem:[%s2073_s1 + $0x50] sm:$0xff]  ;;  %vm2083_vm5 = vmmov %vm2079_vm0 }
 0x164   :  { %992 = vmatpush.msra.mxu0 %v550_v14  ;;  %1013 = vmatpush.msra.mxu1 %v565_v21 }
 0x166   :  { %v461_v25 = vpop.xlane.xlu2 %460  ;;  %v416_v27 = vpop.xlane.xlu1 %415  ;;  %993 = vmatpush.msra.mxu0 %v549_v19 }
 0x167   :  { %v927_v49 = vperm.slane %v461_v25, %v1333_v62  ;;  %v898_v28 = vperm.slane %v416_v27, %v1326_v59  ;;  %v368_v29 = vpop.xlane.xlu0 %367  ;;  %v547_v27 = vld [vmem:[%s2073_s1 + $0x48] sm:$0xff] }
 0x168   :  { %v867_v38 = vperm.slane %v368_v29, %v1326_v59  ;;  %994 = vmatpush.msra.mxu0 %v548_v22  ;;  %v562_v29 = vld [vmem:[%s2073_s1 + $0xc0] sm:$0xff] }
 0x169   :  { %v928_v41 = vsel %vm723_vm6, %v927_v49, %v926_v24  ;;  %v899_v30 = vsel %vm727_vm7, %v898_v28, %v897_v46  ;;  %v563_v49 = vld [vmem:[%s2073_s1 + $0xc8] sm:$0xff]  ;;  %v546_v28 = vld [vmem:[%s2073_s1 + $0x40] sm:$0xff] }
 0x16a   :  { %v868_v31 = vsel %vm727_vm7, %v867_v38, %v866_v12  ;;  %995 = vmatpush.msra.mxu0 %v547_v27  ;;  %v545_v38 = vld [vmem:[%s2073_s1 + $0x38] sm:$0xff] }
 0x16c   :  { %996 = vmatpush.msra.mxu0 %v546_v28 }
 0x16e   :  { %v419_v32 = vpop.xlane.xlu2 %418  ;;  %v371_v36 = vpop.xlane.xlu1 %370  ;;  %997 = vmatpush.msra.mxu0 %v545_v38 }
 0x16f   :  { %v900_v40 = vperm.slane %v419_v32, %v1330_v61  ;;  %v869_v42 = vperm.slane %v371_v36, %v1330_v61  ;;  %v509_v11 = vpop.xlane.xlu0 %508 }
 0x170   :  { %v958_v44 = vperm.slane %v509_v11, %v1333_v62  ;;  %v559_v11 = vld [vmem:[%s2073_s1 + $0xa8] sm:$0xff] }
 0x171   :  { %v901_v45 = vsel %vm731_vm8, %v900_v40, %v899_v30  ;;  %v870_v47 = vsel %vm731_vm8, %v869_v42, %v868_v31  ;;  %v544_v30 = vld [vmem:[%s2073_s1 + $0x30] sm:$0xff]  ;;  %v543_v42 = vld [vmem:[%s2073_s1 + $0x28] sm:$0xff] }
 0x172   :  { %v959_v48 = vsel %vm723_vm6, %v958_v44, %v957_v23  ;;  %v564_v23 = vld [vmem:[%s2073_s1 + $0xd0] sm:$0xff]  ;;  %998 = vmatpush.msra.mxu0 %v544_v30  ;;  %v542_v44 = vld [vmem:[%s2073_s1 + $0x20] sm:$0xff]  ;;  %vm2084_vm6 = vmmov %vm2079_vm0 }
 0x173   :  { %1014 = vmatpush.msra.mxu1 %v564_v23  ;;  %v560_v31 = vld [vmem:[%s2073_s1 + $0xb0] sm:$0xff] }
 0x174   :  { %999 = vmatpush.msra.mxu0 %v543_v42 }
 0x175   :  { %1015 = vmatpush.msra.mxu1 %v563_v49 }
 0x176   :  { %v374_v50 = vpop.xlane.xlu2 %373  ;;  %v512_v51 = vpop.xlane.xlu1 %511  ;;  %1000 = vmatpush.msra.mxu0 %v542_v44 }
 0x177   :  { %v871_v52 = vperm.slane %v374_v50, %v1362_v18  ;;  %v960_v53 = vperm.slane %v512_v51, %v1326_v59  ;;  %v464_v54 = vpop.xlane.xlu0 %463  ;;  %1016 = vmatpush.msra.mxu1 %v562_v29  ;;  %v540_v50 = vld [vmem:[%s2073_s1 + $0x10] sm:$0xff] }
 0x178   :  { %v929_v55 = vperm.slane %v464_v54, %v1326_v59  ;;  %v556_v51 = vld [vmem:[%s2073_s1 + $0x90] sm:$0xff] }
 0x179   :  { %v1855_v56 = vsel %vm735_vm9, %v871_v52, %v870_v47  ;;  %v1858_v62 = vsel %vm727_vm7, %v960_v53, %v959_v48  ;;  %v541_v47 = vld [vmem:[%s2073_s1 + $0x18] sm:$0xff] }
 0x17a   :  { %v930_v57 = vsel %vm727_vm7, %v929_v55, %v928_v41  ;;  %v561_v41 = vld [vmem:[%s2073_s1 + $0xb8] sm:$0xff]  ;;  %1001 = vmatpush.msra.mxu0 %v541_v47  ;;  %v539_v55 = vld [vmem:[%s2073_s1 + $0x8] sm:$0xff]  ;;  %vm2085_vm7 = vmmov %vm2080_vm1 }
 0x17b   :  { %1017 = vmatpush.msra.mxu1 %v561_v41  ;;  %v557_v48 = vld [vmem:[%s2073_s1 + $0x98] sm:$0xff] }
 0x17c   :  { %1002 = vmatpush.msra.mxu0 %v540_v50 }
 0x17d   :  { %1018 = vmatpush.msra.mxu1 %v560_v31 }
 0x17e   :  { %v1861_v60 = vpop.xlane.xlu2 %514  ;;  %v467_v63 = vpop.xlane.xlu1 %466  ;;  %1003 = vmatpush.msra.mxu0 %v539_v55 }
 0x17f   :  { %v931_v0 = vperm.slane %v467_v63, %v1330_v61  ;;  %v422_v1 = vpop.xlane.xlu0 %421  ;;  %1019 = vmatpush.msra.mxu1 %v559_v11  ;;  %v538_v63 = vld [vmem:[%s2073_s1] sm:$0xff] }
 0x180   :  { %v902_v2 = vperm.slane %v422_v1, %v1362_v18  ;;  %1004 = vmatpush.msra.mxu0 %v538_v63 }
 0x181   :  { %v1866_v3 = vsel %vm731_vm8, %v931_v0, %v930_v57  ;;  %v555_v57 = vld [vmem:[%s2073_s1 + $0x88] sm:$0xff]  ;;  %v554_v0 = vld [vmem:[%s2073_s1 + $0x80] sm:$0xff] }
 0x182   :  { %v1869_v59 = vsel %vm735_vm9, %v902_v2, %v901_v45  ;;  %v558_v45 = vld [vmem:[%s2073_s1 + $0xa0] sm:$0xff] }
 0x183   :  { %1020 = vmatpush.msra.mxu1 %v558_v45 }
 0x185   :  { %1021 = vmatpush.msra.mxu1 %v557_v48 }
 0x186   :  { %v1871_v4 = vpop.xlane.xlu2 %469  ;;  %v1873_v5 = vpop.xlane.xlu1 %424 }
 0x187   :  { %v1875_v6 = vpop.xlane.xlu0 %376  ;;  %1022 = vmatpush.msra.mxu1 %v556_v51  ;;  %v904_v27 = vperm.slane %v1873_v5, %v1355_v15  ;;  %v962_v5 = vperm.slane %v1861_v60, %v1330_v61 }
 0x188   :  { %v873_v8 = vperm.slane %v1875_v6, %v1355_v15 }
 0x189   :  { %1023 = vmatpush.msra.mxu1 %v555_v57  ;;  %v905_v41 = vsel %vm739_vm10, %v904_v27, %v1869_v59  ;;  %v963_v48 = vsel %vm731_vm8, %v962_v5, %v1858_v62  ;;  %vm2086_vm8 = vmmov %vm2080_vm1 }
 0x18a   :  { %v874_v13 = vsel %vm739_vm10, %v873_v8, %v1855_v56 }
 0x18b   :  { %1024 = vmatpush.msra.mxu1 %v554_v0 }
 0x18e   :  { %v1889_v43 = vpop.xlane.xlu2 %427  ;;  %v1891_v12 = vpop.xlane.xlu1 %379 }
 0x18f   :  { %v1893_v37 = vpop.xlane.xlu0 %517  ;;  %v875_v9 = vperm.slane %v1891_v12, %v1358_v16  ;;  %v906_v49 = vperm.slane %v1889_v43, %v1358_v16 }
 0x190   :  { %v964_v43 = vperm.slane %v1893_v37, %v1362_v18 }
 0x191   :  { %v876_v17 = vsel %vm2079_vm0, %v875_v9, %v874_v13  ;;  %v907_v31 = vsel %vm2081_vm3, %v906_v49, %v905_v41 }
 0x192   :  { %v965_v50 = vsel %vm735_vm9, %v964_v43, %v963_v48 }
 0x196   :  { %v1919_v24 = vpop.xlane.xlu2 %382  ;;  %v1921_v46 = vpop.xlane.xlu1 %520 }
 0x197   :  { %v1923_v25 = vpop.xlane.xlu0 %472  ;;  %v877_v10 = vperm.slane %v1919_v24, %v1389_v39  ;;  %v966_v59 = vperm.slane %v1921_v46, %v1355_v15 }
 0x198   :  { %v935_v61 = vperm.slane %v1923_v25, %v1355_v15 }
 0x199   :  { %v878_v19 = vsel %vm2080_vm1, %v877_v10, %v876_v17  ;;  %v967_v51 = vsel %vm739_vm10, %v966_v59, %v965_v50 }
 0x19e   :  { %v1949_v32 = vpop.xlane.xlu2 %523  ;;  %v1951_v36 = vpop.xlane.xlu1 %475 }
 0x19f   :  { %v431_v40 = vpop.xlane.xlu0 %430  ;;  %v968_v60 = vperm.slane %v1949_v32, %v1358_v16 }
 0x1a0   :  { %v908_v29 = vperm.slane %v431_v40, %v1389_v39  ;;  %v933_v40 = vperm.slane %v1871_v4, %v1362_v18  ;;  %v937_v18 = vperm.slane %v1951_v36, %v1358_v16 }
 0x1a2   :  { %v934_v62 = vsel %vm735_vm9, %v933_v40, %v1866_v3  ;;  %vm982_vm9 = vcmask 1043459  }
 0x1a6   :  { %v1977_v52 = vpop.xlane.xlu2 %478  ;;  %v434_v53 = vpop.xlane.xlu1 %433 }
 0x1a7   :  { %v386_v54 = vpop.xlane.xlu0 %385  ;;  %v910_v38 = vperm.slane %v434_v53, %v1382_v33  ;;  %v939_v15 = vperm.slane %v1977_v52, %v1389_v39  ;;  %v936_v53 = vsel %vm739_vm10, %v935_v61, %v934_v62 }
 0x1a8   :  { %v879_v35 = vperm.slane %v386_v54, %v1382_v33  ;;  %v969_v54 = vsel %vm2083_vm5, %v968_v60, %v967_v51  ;;  %v938_v52 = vsel %vm2084_vm6, %v937_v18, %v936_v53 }
 0x1a9   :  { %v940_v57 = vsel %vm2086_vm8, %v939_v15, %v938_v52 }
 0x1aa   :  { %v880_v6 = vsel %vm751_vm13, %v879_v35, %v878_v19  ;;  %v1048_v35 = vld [vmem:[%s2074_s2] ss:$0 sm:$0xff] }
 0x1ab   :  { %23 = vst [vmem:[#allocation2] sm:$0xf] %v1048_v35 }
 0x1ae   :  { %v437_v1 = vpop.xlane.xlu2 %436  ;;  %v389_v2 = vpop.xlane.xlu1 %388 }
 0x1af   :  { %v527_v7 = vpop.xlane.xlu0 %526  ;;  %v881_v14 = vperm.slane %v389_v2, %v1385_v34  ;;  %v912_v30 = vperm.slane %v437_v1, %v1385_v34 }
 0x1b0   :  { %v970_v4 = vperm.slane %v527_v7, %v1389_v39 }
 0x1b1   :  { %v882_v24 = vsel %vm755_vm14, %v881_v14, %v880_v6 }
 0x1b2   :  { %v971_v55 = vsel %vm2085_vm7, %v970_v4, %v969_v54 }
 0x1b6   :  { %v392_v21 = vpop.xlane.xlu2 %391  ;;  %v530_v22 = vpop.xlane.xlu1 %529 }
 0x1b7   :  { %v883_v12 = vperm.slane %v392_v21, %v1410_v58  ;;  %v482_v23 = vpop.xlane.xlu0 %481  ;;  %v972_v25 = vperm.slane %v530_v22, %v1382_v33 }
 0x1b8   :  { %v941_v16 = vperm.slane %v482_v23, %v1382_v33 }
 0x1b9   :  { %v884_v56 = vsel %vm759_vm15, %v883_v12, %v882_v24  ;;  %v973_v3 = vsel %vm751_vm13, %v972_v25, %v971_v55 }
 0x1ba   :  { %v981_v28 = vsel %vm980_vm2, %v884_v56, %v1620_v26  ;;  %v909_v26 = vsel %vm2082_vm4, %v908_v29, %v907_v31  ;;  %v942_v0 = vsel %vm751_vm13, %v941_v16, %v940_v57 }
 0x1bb   :  { %v911_v44 = vsel %vm751_vm13, %v910_v38, %v909_v26 }
 0x1bc   :  { %v913_v37 = vsel %vm755_vm14, %v912_v30, %v911_v44 }
 0x1be   :  { %v485_v42 = vpop.xlane.xlu1 %484  ;;  %v533_v47 = vpop.xlane.xlu2 %532 }
 0x1bf   :  { %v440_v11 = vpop.xlane.xlu0 %439  ;;  %v974_v36 = vperm.slane %v533_v47, %v1385_v34  ;;  %v943_v39 = vperm.slane %v485_v42, %v1385_v34 }
 0x1c0   :  { %v914_v45 = vperm.slane %v440_v11, %v1410_v58 }
 0x1c1   :  { %v975_v2 = vsel %vm755_vm14, %v974_v36, %v973_v3  ;;  %v944_v34 = vsel %vm755_vm14, %v943_v39, %v942_v0 }
 0x1c2   :  { %v915_v46 = vsel %vm759_vm15, %v914_v45, %v913_v37 }
 0x1c3   :  { %v985_v32 = vsel %vm980_vm2, %v915_v46, %v1724_v20 }
 0x1c6   :  { %v536_v20 = vpop.xlane.xlu1 %535 }
 0x1c7   :  { %v976_v63 = vperm.slane %v536_v20, %v1410_v58  ;;  %v488_v33 = vpop.xlane.xlu0 %487 }
 0x1c8   :  { %v945_v1 = vperm.slane %v488_v33, %v1410_v58  ;;  %v537_v58 = vld [vmem:[#allocation2] sm:$0xf] }
 0x1c9   :  { %v977_v7 = vsel %vm759_vm15, %v976_v63, %v975_v2 }
 0x1ca   :  { %v946_v8 = vsel %vm759_vm15, %v945_v1, %v944_v34  ;;  %v986_v9 = vsel %vm982_vm9, %v977_v7, %v985_v32 }
 0x1cb   :  { %v983_v10 = vsel %vm982_vm9, %v946_v8, %v981_v28  ;;  %1025 = vmatmul.f32.vlgmr.msra.gmra.mxu1 %v986_v9 }
 0x1cc   :  { %1005 = vmatmul.f32.vlgmr.msra.gmra.mxu0 %v983_v10 }
 0x248   :  { %v1026_v13 = vpop.f32.mrf.mxu1 }
 0x249   :  { %v1006_v14 = vpop.f32.mrf.mxu0 }
 0x24a   :  { %v1027_v17 = vadd.f32 %v1026_v13, %v1006_v14 }
 0x24c   :  { %v1029_v19 = vadd.f32 %v1027_v17, %v537_v58 }
 0x24e   :  { %1030 = vst [vmem:[#allocation2] sm:$0xf] %v1029_v19 }
 0x24f   :  { %1041 = dma.vmem_to_hbm [thread:$0]  %s1037_s7, 64, %s1039_s10, [#allocation3]  }
 0x250   :  { %1073 = dma.done.wait [#allocation3], 64  }
 0x251   :  { %1074 = vsyncadd [#allocation3], 4294967232 }
 0x252   :  { %1046 = vsyncpa [#allocation3], 1 }

</bundles_post_ra>
